<compile_context>
chip_gen: v7x
topology: tpu7x:2x2x1
jax: 0.10.0
libtpu: 0.0.40
codegen_flags: <defaults>
</compile_context>

<pallas_src>
import functools

import jax
import jax.numpy as jnp
from jax.experimental import pallas as pl
from jax.experimental.pallas import tpu as pltpu


def _round_up(a, m):
    return (a + m - 1) // m * m


# ----------------------------------------------------------------------------
# Fused TemporalBlock kernel.  One grid step == (sample n, length-tile t).
# ----------------------------------------------------------------------------
def _temporal_block_kernel(x_ref, w1_ref, b1_ref, w2_ref, b2_ref, *rest,
                           K, d, p, LT, C_in, C_out, has_downsample, mxu_dtype):
    # x_ref : (1, C_in, LT)     current input tile (original dtype, NCL layout)
    # w1_ref: (C_out, K*C_in)   conv1 taps, im2col-flattened (mxu_dtype)
    # b1_ref: (C_out, 1)        conv1 bias (f32)
    # w2_ref: (C_out, K*C_out)  conv2 taps, im2col-flattened (mxu_dtype)
    # b2_ref: (C_out, 1)        conv2 bias (f32)
    # [wd_ref: (C_out, C_in), bd_ref: (C_out, 1)]  1x1 downsample (optional)
    # o_ref : (1, C_out, LT)    output tile
    # slab1 : (K*C_in,  LT)     VMEM conv1 im2col slab (mxu_dtype)
    # slab2 : (K*C_out, LT)     VMEM conv2 im2col slab (mxu_dtype)
    # xh    : (C_in,  max(p,1)) VMEM left halo of x, carried across tiles
    # hh    : (C_out, max(p,1)) VMEM left halo of conv1 output, carried across tiles
    if has_downsample:
        wd_ref, bd_ref, o_ref, slab1, slab2, xh, hh = rest
    else:
        o_ref, slab1, slab2, xh, hh = rest

    t = pl.program_id(1)
    x_cur = x_ref[0]                       # (C_in, LT)
    x_bf = x_cur.astype(mxu_dtype)         # cast once; reused by conv1 + residual

    # Left halos are the conv zero-padding at the first tile of every sample.
    if p > 0:
        @pl.when(t == 0)
        def _():
            xh[...] = jnp.zeros_like(xh)
            hh[...] = jnp.zeros_like(hh)

    # ---- conv1 im2col slab: row-block k, column c  <->  x[j0 + c + k*d - p].
    # Only the halo / data columns actually needed are written (no full-slab
    # zero fill); tap offsets are inherently not 128-aligned (dilation).
    for k in range(K):
        w = p - k * d                      # static halo width for this tap
        hw = min(w, LT)
        if hw > 0:
            slab1[k * C_in:(k + 1) * C_in, 0:hw] = xh[:, k * d:k * d + hw]
        if LT - w > 0:
            slab1[k * C_in:(k + 1) * C_in, w:LT] = x_bf[:, 0:LT - w]
    if 0 < p <= LT:
        xh[...] = x_bf[:, LT - p:LT]       # halo for the next tile of this sample

    # ---- conv1 + bias + ReLU: ONE MXU matmul, contraction K*C_in.
    h = jnp.dot(w1_ref[...], slab1[...], preferred_element_type=jnp.float32)
    h = jnp.maximum(h + b1_ref[...], 0.0)
    # TODO(synk): training-mode nn.Dropout (Bernoulli masking) not reproduced;
    # dropout is identity at inference.
    h_bf = h.astype(mxu_dtype)

    # ---- conv2 im2col slab: row-block k, column c  <->  h[j0 + c + k*d - p].
    for k in range(K):
        w = p - k * d
        hw = min(w, LT)
        if hw > 0:
            slab2[k * C_out:(k + 1) * C_out, 0:hw] = hh[:, k * d:k * d + hw]
        if LT - w > 0:
            slab2[k * C_out:(k + 1) * C_out, w:LT] = h_bf[:, 0:LT - w]
    if 0 < p <= LT:
        hh[...] = h_bf[:, LT - p:LT]

    # ---- conv2 + bias + ReLU: ONE MXU matmul, contraction K*C_out.
    out = jnp.dot(w2_ref[...], slab2[...], preferred_element_type=jnp.float32)
    out = jnp.maximum(out + b2_ref[...], 0.0)

    # ---- residual path (fused 1x1 downsample) + add + final ReLU.
    if has_downsample:
        res = jnp.dot(wd_ref[...], x_bf,
                      preferred_element_type=jnp.float32) + bd_ref[...]
    else:
        res = x_cur.astype(jnp.float32)    # identity residual stays exact f32
    o_ref[0] = jnp.maximum(out + res, 0.0).astype(o_ref.dtype)


# ----------------------------------------------------------------------------
# Wrapper
# ----------------------------------------------------------------------------
def temporal_block_forward(x, w1, b1, w2, b2, wd, bd, *, kernel_size, dilation,
                           padding, mxu_dtype=jnp.bfloat16, l_tile=512):
    """x: (N, C_in, L) NCL; w1: (K, C_out, C_in); w2: (K, C_out, C_out);
    wd: (C_out, C_in) or None.  Returns (N, C_out, L) NCL."""
    N, C_in, L = x.shape
    K, C_out, _ = w1.shape
    d, p = dilation, padding
    assert K == kernel_size
    # Standard causal-TCN geometry: the final crop lands at length L and the
    # composite conv1->conv2 receptive field is a pure left halo, which is what
    # enables the streaming halo carry across length tiles.
    # TODO(synk): general padding (p != d*(K-1)) and stride > 1 would need a
    # whole-sample fallback path.
    assert p == d * (K - 1), "only causal TCN padding (= dilation*(K-1)) supported"
    L_out = L
    has_downsample = wd is not None

    # Length tile: multiple of 128 lanes (dense stores) and >= the halo p.
    if L_out <= 128:
        LT = L_out                                 # single tile == full length
    else:
        LT = max(128, _round_up(p, 128),
                 min(_round_up(max(l_tile, 128), 128), _round_up(L_out, 128)))
        LT = min(LT, _round_up(L_out, 128))
    T = pl.cdiv(L_out, LT)

    # im2col-flattened weights: one matmul per conv, contraction K*C.
    w1_flat = jnp.transpose(w1, (1, 0, 2)).reshape(C_out, K * C_in).astype(mxu_dtype)
    w2_flat = jnp.transpose(w2, (1, 0, 2)).reshape(C_out, K * C_out).astype(mxu_dtype)
    b1_col = b1.reshape(C_out, 1).astype(jnp.float32)
    b2_col = b2.reshape(C_out, 1).astype(jnp.float32)

    kernel = functools.partial(
        _temporal_block_kernel, K=K, d=d, p=p, LT=LT, C_in=C_in, C_out=C_out,
        has_downsample=has_downsample, mxu_dtype=mxu_dtype)

    in_specs = [
        pl.BlockSpec((1, C_in, LT), lambda n, t: (n, 0, t)),
        pl.BlockSpec((C_out, K * C_in), lambda n, t: (0, 0)),
        pl.BlockSpec((C_out, 1), lambda n, t: (0, 0)),
        pl.BlockSpec((C_out, K * C_out), lambda n, t: (0, 0)),
        pl.BlockSpec((C_out, 1), lambda n, t: (0, 0)),
    ]
    args = [x, w1_flat, b1_col, w2_flat, b2_col]
    if has_downsample:
        in_specs += [pl.BlockSpec((C_out, C_in), lambda n, t: (0, 0)),
                     pl.BlockSpec((C_out, 1), lambda n, t: (0, 0))]
        args += [wd.astype(mxu_dtype), bd.reshape(C_out, 1).astype(jnp.float32)]

    scratch_shapes = [
        pltpu.VMEM((K * C_in, LT), mxu_dtype),       # conv1 im2col slab
        pltpu.VMEM((K * C_out, LT), mxu_dtype),      # conv2 im2col slab
        pltpu.VMEM((C_in, max(p, 1)), mxu_dtype),    # x left-halo carry
        pltpu.VMEM((C_out, max(p, 1)), mxu_dtype),   # conv1-output left-halo carry
    ]

    # --- explicit VMEM budget derived from the block/scratch sizes.
    xb = jnp.dtype(x.dtype).itemsize
    mb = jnp.dtype(mxu_dtype).itemsize
    est = (2 * C_in * LT * xb + 2 * C_out * LT * xb                  # x/out blocks (double-buffered)
           + 2 * (C_out * K * C_in + C_out * K * C_out
                  + (C_out * C_in if has_downsample else 0)) * mb    # weights
           + 2 * 3 * C_out * 4                                       # biases
           + (K * C_in * LT + K * C_out * LT) * mb                   # im2col slabs
           + (C_in + C_out) * max(p, 1) * mb                         # halo carries
           + 4 * C_out * LT * 4 + 2 * C_in * LT * 4)                 # f32 temporaries
    try:
        vmem_cap = pltpu.get_tpu_info().vmem_capacity_bytes - (8 << 20)
    except Exception:
        vmem_cap = 56 << 20      # conservative: v7x has 64 MiB physical VMEM
    vmem_limit = int(min(max(2 * est + (4 << 20), 32 << 20), vmem_cap))

    flops = 2 * N * L_out * (K * C_in * C_out + K * C_out * C_out
                             + (C_in * C_out if has_downsample else 0))
    bytes_accessed = int(N * C_in * L * xb + N * C_out * L_out * xb
                         + (K * C_out * (C_in + C_out)
                            + (C_out * C_in if has_downsample else 0)) * mb
                         + 3 * C_out * 4)

    return pl.pallas_call(
        kernel,
        out_shape=jax.ShapeDtypeStruct((N, C_out, L_out), x.dtype),
        grid_spec=pltpu.PrefetchScalarGridSpec(
            num_scalar_prefetch=0,
            grid=(N, T),
            in_specs=in_specs,
            out_specs=pl.BlockSpec((1, C_out, LT), lambda n, t: (n, 0, t)),
            scratch_shapes=scratch_shapes,
        ),
        compiler_params=pltpu.CompilerParams(
            # The tile axis must stay sequential: the x / conv1-output halos
            # are carried across length tiles in VMEM scratch.
            dimension_semantics=("parallel", "arbitrary"),
            vmem_limit_bytes=vmem_limit),
        cost_estimate=pl.CostEstimate(flops=flops, transcendentals=0,
                                      bytes_accessed=bytes_accessed),
    )(*args)


# ----------------------------------------------------------------------------
# TemporalBlock (forward semantics of the PyTorch module)
# ----------------------------------------------------------------------------
class TemporalBlockPallas:
    def __init__(self, key, n_inputs, n_outputs, kernel_size, stride,
                 dilation, padding, dropout=0.2, mxu_dtype=jnp.bfloat16,
                 l_tile=512):
        # TODO(synk): stride > 1 not implemented (TCN usage is stride=1).
        assert stride == 1, "only stride=1 supported"
        self.kernel_size = kernel_size
        self.dilation = dilation
        self.padding = padding
        self.mxu_dtype = mxu_dtype
        self.l_tile = l_tile
        k1, k2, k3, k4, k5, k6 = jax.random.split(key, 6)
        # weight_norm(v, g) with g initialized to ||v|| is an identity
        # reparameterization at init, so effective weights are the N(0, 0.01)
        # draws themselves.  Weights stored as (K, C_out, C_in) == PyTorch
        # (C_out, C_in, K) transposed with (2, 0, 1).
        self.w1 = 0.01 * jax.random.normal(
            k1, (kernel_size, n_outputs, n_inputs), jnp.float32)
        self.b1 = 0.01 * jax.random.normal(k2, (n_outputs,), jnp.float32)
        self.w2 = 0.01 * jax.random.normal(
            k3, (kernel_size, n_outputs, n_outputs), jnp.float32)
        self.b2 = 0.01 * jax.random.normal(k4, (n_outputs,), jnp.float32)
        if n_inputs != n_outputs:
            self.wd = 0.01 * jax.random.normal(
                k5, (n_outputs, n_inputs), jnp.float32)
            self.bd = 0.01 * jax.random.normal(k6, (n_outputs,), jnp.float32)
        else:
            self.wd = None
            self.bd = None

    def __call__(self, x_ncl):  # x: (N, C_in, L), same layout as PyTorch
        return temporal_block_forward(
            x_ncl, self.w1, self.b1, self.w2, self.b2, self.wd, self.bd,
            kernel_size=self.kernel_size, dilation=self.dilation,
            padding=self.padding, mxu_dtype=self.mxu_dtype, l_tile=self.l_tile)


# ----------------------------------------------------------------------------
# Pure-JAX f32 reference (mirrors the PyTorch forward exactly)
# ----------------------------------------------------------------------------
def _conv1d_ref(x, w, b, dilation, padding):
    # x: (N, C_in, L); w: (K, C_out, C_in); b: (C_out,)
    x_pad = jnp.pad(x, ((0, 0), (0, 0), (padding, padding)))
    K, C_out, _ = w.shape
    L_out = x_pad.shape[2] - dilation * (K - 1)
    acc = jnp.zeros((x.shape[0], C_out, L_out), jnp.float32)
    for k in range(K):
        acc = acc + jnp.einsum(
            "oc,ncl->nol", w[k],
            x_pad[:, :, k * dilation:k * dilation + L_out])
    return acc + b[None, :, None]


def _reference_forward(block, x):
    out = jnp.maximum(
        _conv1d_ref(x, block.w1, block.b1, block.dilation, block.padding), 0.0)
    out = jnp.maximum(
        _conv1d_ref(out, block.w2, block.b2, block.dilation, block.padding), 0.0)
    if block.wd is not None:
        res = _conv1d_ref(x, block.wd[None], block.bd, 1, 0)
    else:
        res = x
    Lm = min(out.shape[2], res.shape[2])
    return jnp.maximum(out[:, :, :Lm] + res[:, :, :Lm], 0.0)


# ----------------------------------------------------------------------------
if __name__ == "__main__":
    key = jax.random.PRNGKey(0)
    k_param, k_x, k_param2, k_x2 = jax.random.split(key, 4)

    # Case 1: channel-expanding block (1x1 downsample residual), single L tile.
    N, n_inputs, n_outputs, L = 2, 4, 8, 16
    kernel_size, stride, dilation = 3, 1, 2
    padding = (kernel_size - 1) * dilation          # standard causal TCN padding
    block = TemporalBlockPallas(k_param, n_inputs, n_outputs, kernel_size,
                                stride, dilation, padding, dropout=0.2)
    x = jax.random.normal(k_x, (N, n_inputs, L), jnp.float32)  # NCL, like PyTorch
    y = jax.block_until_ready(block(x))
    y_ref = _reference_forward(block, x)
    assert y.shape == y_ref.shape, (y.shape, y_ref.shape)
    err1 = float(jnp.max(jnp.abs(y - y_ref)))
    assert err1 < 5e-3, f"case1 mismatch vs reference: max abs err {err1}"

    # Case 2: identity residual, several L tiles (exercises the halo carry).
    N2, C2, L2 = 2, 8, 300
    ks2, dil2 = 3, 4
    pad2 = (ks2 - 1) * dil2
    block2 = TemporalBlockPallas(k_param2, C2, C2, ks2, 1, dil2, pad2,
                                 dropout=0.2, l_tile=128)
    x2 = jax.random.normal(k_x2, (N2, C2, L2), jnp.float32)
    y2 = jax.block_until_ready(block2(x2))
    y2_ref = _reference_forward(block2, x2)
    assert y2.shape == y2_ref.shape, (y2.shape, y2_ref.shape)
    err2 = float(jnp.max(jnp.abs(y2 - y2_ref)))
    assert err2 < 5e-3, f"case2 mismatch vs reference: max abs err {err2}"

    print("KERNEL_OK")
</pallas_src>

<mosaic_0001>
module attributes {stable_mosaic.version = 11 : i64} {
  func.func @_temporal_block_kernel(%arg0: i32, %arg1: i32, %arg2: memref<1x4x16xf32, #tpu.memory_space<vmem>>, %arg3: memref<8x12xbf16, #tpu.memory_space<vmem>>, %arg4: memref<8x1xf32, #tpu.memory_space<vmem>>, %arg5: memref<8x24xbf16, #tpu.memory_space<vmem>>, %arg6: memref<8x1xf32, #tpu.memory_space<vmem>>, %arg7: memref<8x4xbf16, #tpu.memory_space<vmem>>, %arg8: memref<8x1xf32, #tpu.memory_space<vmem>>, %arg9: memref<1x8x16xf32, #tpu.memory_space<vmem>>, %arg10: memref<12x16xbf16, #tpu.memory_space<vmem>>, %arg11: memref<24x16xbf16, #tpu.memory_space<vmem>>, %arg12: memref<4x4xbf16, #tpu.memory_space<vmem>>, %arg13: memref<8x4xbf16, #tpu.memory_space<vmem>>) attributes {dimension_semantics = [#tpu.dimension_semantics<parallel>, #tpu.dimension_semantics<arbitrary>], iteration_bounds = array<i64: 2, 1>, scalar_prefetch = 0 : i64, scratch_operands = 4 : i64, tpu.core_type = #tpu.core_type<tc>, window_params = [{transform_indices = @transform_0, window_bounds = array<i64: 1, 4, 16>}, {pipeline_mode = #tpu.pipeline_mode<synchronous>, transform_indices = @transform_1, window_bounds = array<i64: 8, 12>}, {pipeline_mode = #tpu.pipeline_mode<synchronous>, transform_indices = @transform_2, window_bounds = array<i64: 8, 1>}, {pipeline_mode = #tpu.pipeline_mode<synchronous>, transform_indices = @transform_3, window_bounds = array<i64: 8, 24>}, {pipeline_mode = #tpu.pipeline_mode<synchronous>, transform_indices = @transform_4, window_bounds = array<i64: 8, 1>}, {pipeline_mode = #tpu.pipeline_mode<synchronous>, transform_indices = @transform_5, window_bounds = array<i64: 8, 4>}, {pipeline_mode = #tpu.pipeline_mode<synchronous>, transform_indices = @transform_6, window_bounds = array<i64: 8, 1>}, {transform_indices = @transform_7, window_bounds = array<i64: 1, 8, 16>}]} {
    %c0 = arith.constant 0 : index
    %c0_0 = arith.constant 0 : index
    %c0_1 = arith.constant 0 : index
    %0 = vector.load %arg2[%c0, %c0_0, %c0_1] : memref<1x4x16xf32, #tpu.memory_space<vmem>>, vector<1x4x16xf32>
    %1 = vector.shape_cast %0 : vector<1x4x16xf32> to vector<4x16xf32>
    %2 = arith.truncf %1 : vector<4x16xf32> to vector<4x16xbf16>
    %c0_i32 = arith.constant 0 : i32
    %3 = arith.cmpi eq, %arg1, %c0_i32 : i32
    %4 = arith.extui %3 : i1 to i32
    %c0_i32_2 = arith.constant 0 : i32
    %5 = arith.cmpi ne, %4, %c0_i32_2 : i32
    scf.if %5 {
      %cst_55 = arith.constant 0.000000e+00 : bf16
      %56 = vector.broadcast %cst_55 : bf16 to vector<4x4xbf16>
      %c0_56 = arith.constant 0 : index
      %c0_57 = arith.constant 0 : index
      %57 = vector.load %arg12[%c0_56, %c0_57] : memref<4x4xbf16, #tpu.memory_space<vmem>>, vector<4x4xbf16>
      tpu.vector_store %arg12[%c0_56, %c0_57], %56 {strides = array<i32>} : memref<4x4xbf16, #tpu.memory_space<vmem>>, vector<4x4xbf16>,
      %cst_58 = arith.constant 0.000000e+00 : bf16
      %58 = vector.broadcast %cst_58 : bf16 to vector<8x4xbf16>
      %c0_59 = arith.constant 0 : index
      %c0_60 = arith.constant 0 : index
      %59 = vector.load %arg13[%c0_59, %c0_60] : memref<8x4xbf16, #tpu.memory_space<vmem>>, vector<8x4xbf16>
      tpu.vector_store %arg13[%c0_59, %c0_60], %58 {strides = array<i32>} : memref<8x4xbf16, #tpu.memory_space<vmem>>, vector<8x4xbf16>,
    } else {
    }
    %c0_3 = arith.constant 0 : index
    %c0_4 = arith.constant 0 : index
    %6 = vector.load %arg12[%c0_3, %c0_4] : memref<4x4xbf16, #tpu.memory_space<vmem>>, vector<4x4xbf16>
    %c0_5 = arith.constant 0 : index
    %c0_6 = arith.constant 0 : index
    %7 = vector.load %arg10[%c0_5, %c0_6] : memref<12x16xbf16, #tpu.memory_space<vmem>>, vector<4x4xbf16>
    tpu.vector_store %arg10[%c0_5, %c0_6], %6 {strides = array<i32>} : memref<12x16xbf16, #tpu.memory_space<vmem>>, vector<4x4xbf16>,
    %8 = vector.extract_strided_slice %2 {offsets = [0, 0], sizes = [4, 12], strides = [1, 1]} : vector<4x16xbf16> to vector<4x12xbf16>
    %c0_7 = arith.constant 0 : index
    %c4 = arith.constant 4 : index
    %9 = vector.load %arg10[%c0_7, %c4] : memref<12x16xbf16, #tpu.memory_space<vmem>>, vector<4x12xbf16>
    tpu.vector_store %arg10[%c0_7, %c4], %8 {strides = array<i32>} : memref<12x16xbf16, #tpu.memory_space<vmem>>, vector<4x12xbf16>,
    %c0_8 = arith.constant 0 : index
    %c2 = arith.constant 2 : index
    %10 = vector.load %arg12[%c0_8, %c2] : memref<4x4xbf16, #tpu.memory_space<vmem>>, vector<4x2xbf16>
    %c4_9 = arith.constant 4 : index
    %c0_10 = arith.constant 0 : index
    %11 = vector.load %arg10[%c4_9, %c0_10] : memref<12x16xbf16, #tpu.memory_space<vmem>>, vector<4x2xbf16>
    tpu.vector_store %arg10[%c4_9, %c0_10], %10 {strides = array<i32>} : memref<12x16xbf16, #tpu.memory_space<vmem>>, vector<4x2xbf16>,
    %12 = vector.extract_strided_slice %2 {offsets = [0, 0], sizes = [4, 14], strides = [1, 1]} : vector<4x16xbf16> to vector<4x14xbf16>
    %c4_11 = arith.constant 4 : index
    %c2_12 = arith.constant 2 : index
    %13 = vector.load %arg10[%c4_11, %c2_12] : memref<12x16xbf16, #tpu.memory_space<vmem>>, vector<4x14xbf16>
    tpu.vector_store %arg10[%c4_11, %c2_12], %12 {strides = array<i32>} : memref<12x16xbf16, #tpu.memory_space<vmem>>, vector<4x14xbf16>,
    %c8 = arith.constant 8 : index
    %c0_13 = arith.constant 0 : index
    %14 = vector.load %arg10[%c8, %c0_13] : memref<12x16xbf16, #tpu.memory_space<vmem>>, vector<4x16xbf16>
    tpu.vector_store %arg10[%c8, %c0_13], %2 {strides = array<i32>} : memref<12x16xbf16, #tpu.memory_space<vmem>>, vector<4x16xbf16>,
    %15 = vector.extract_strided_slice %2 {offsets = [0, 12], sizes = [4, 4], strides = [1, 1]} : vector<4x16xbf16> to vector<4x4xbf16>
    %c0_14 = arith.constant 0 : index
    %c0_15 = arith.constant 0 : index
    %16 = vector.load %arg12[%c0_14, %c0_15] : memref<4x4xbf16, #tpu.memory_space<vmem>>, vector<4x4xbf16>
    tpu.vector_store %arg12[%c0_14, %c0_15], %15 {strides = array<i32>} : memref<4x4xbf16, #tpu.memory_space<vmem>>, vector<4x4xbf16>,
    %c0_16 = arith.constant 0 : index
    %c0_17 = arith.constant 0 : index
    %17 = vector.load %arg3[%c0_16, %c0_17] : memref<8x12xbf16, #tpu.memory_space<vmem>>, vector<8x12xbf16>
    %c0_18 = arith.constant 0 : index
    %c0_19 = arith.constant 0 : index
    %18 = vector.load %arg10[%c0_18, %c0_19] : memref<12x16xbf16, #tpu.memory_space<vmem>>, vector<12x16xbf16>
    %cst = arith.constant dense<0.000000e+00> : vector<8x16xf32>
    %19 = tpu.matmul %17, %18, %cst {dimension_numbers = #tpu.dot_dimension_numbers<[1], [0], [0], [1], [0, 0, 1, 1], [], []>} : vector<8x12xbf16>, vector<12x16xbf16>, vector<8x16xf32> -> vector<8x16xf32>
    %c0_20 = arith.constant 0 : index
    %c0_21 = arith.constant 0 : index
    %20 = vector.load %arg4[%c0_20, %c0_21] : memref<8x1xf32, #tpu.memory_space<vmem>>, vector<8x1xf32>
    %21 = vector.broadcast %20 : vector<8x1xf32> to vector<8x16xf32>
    %22 = arith.addf %19, %21 : vector<8x16xf32>
    %cst_22 = arith.constant 0.000000e+00 : f32
    %23 = vector.broadcast %cst_22 : f32 to vector<8x16xf32>
    %24 = arith.maximumf %22, %23 : vector<8x16xf32>
    %25 = arith.truncf %24 : vector<8x16xf32> to vector<8x16xbf16>
    %c0_23 = arith.constant 0 : index
    %c0_24 = arith.constant 0 : index
    %26 = vector.load %arg13[%c0_23, %c0_24] : memref<8x4xbf16, #tpu.memory_space<vmem>>, vector<8x4xbf16>
    %c0_25 = arith.constant 0 : index
    %c0_26 = arith.constant 0 : index
    %27 = vector.load %arg11[%c0_25, %c0_26] : memref<24x16xbf16, #tpu.memory_space<vmem>>, vector<8x4xbf16>
    tpu.vector_store %arg11[%c0_25, %c0_26], %26 {strides = array<i32>} : memref<24x16xbf16, #tpu.memory_space<vmem>>, vector<8x4xbf16>,
    %28 = vector.extract_strided_slice %25 {offsets = [0, 0], sizes = [8, 12], strides = [1, 1]} : vector<8x16xbf16> to vector<8x12xbf16>
    %c0_27 = arith.constant 0 : index
    %c4_28 = arith.constant 4 : index
    %29 = vector.load %arg11[%c0_27, %c4_28] : memref<24x16xbf16, #tpu.memory_space<vmem>>, vector<8x12xbf16>
    tpu.vector_store %arg11[%c0_27, %c4_28], %28 {strides = array<i32>} : memref<24x16xbf16, #tpu.memory_space<vmem>>, vector<8x12xbf16>,
    %c0_29 = arith.constant 0 : index
    %c2_30 = arith.constant 2 : index
    %30 = vector.load %arg13[%c0_29, %c2_30] : memref<8x4xbf16, #tpu.memory_space<vmem>>, vector<8x2xbf16>
    %c8_31 = arith.constant 8 : index
    %c0_32 = arith.constant 0 : index
    %31 = vector.load %arg11[%c8_31, %c0_32] : memref<24x16xbf16, #tpu.memory_space<vmem>>, vector<8x2xbf16>
    tpu.vector_store %arg11[%c8_31, %c0_32], %30 {strides = array<i32>} : memref<24x16xbf16, #tpu.memory_space<vmem>>, vector<8x2xbf16>,
    %32 = vector.extract_strided_slice %25 {offsets = [0, 0], sizes = [8, 14], strides = [1, 1]} : vector<8x16xbf16> to vector<8x14xbf16>
    %c8_33 = arith.constant 8 : index
    %c2_34 = arith.constant 2 : index
    %33 = vector.load %arg11[%c8_33, %c2_34] : memref<24x16xbf16, #tpu.memory_space<vmem>>, vector<8x14xbf16>
    tpu.vector_store %arg11[%c8_33, %c2_34], %32 {strides = array<i32>} : memref<24x16xbf16, #tpu.memory_space<vmem>>, vector<8x14xbf16>,
    %c16 = arith.constant 16 : index
    %c0_35 = arith.constant 0 : index
    %34 = vector.load %arg11[%c16, %c0_35] : memref<24x16xbf16, #tpu.memory_space<vmem>>, vector<8x16xbf16>
    tpu.vector_store %arg11[%c16, %c0_35], %25 {strides = array<i32>} : memref<24x16xbf16, #tpu.memory_space<vmem>>, vector<8x16xbf16>,
    %35 = vector.extract_strided_slice %25 {offsets = [0, 12], sizes = [8, 4], strides = [1, 1]} : vector<8x16xbf16> to vector<8x4xbf16>
    %c0_36 = arith.constant 0 : index
    %c0_37 = arith.constant 0 : index
    %36 = vector.load %arg13[%c0_36, %c0_37] : memref<8x4xbf16, #tpu.memory_space<vmem>>, vector<8x4xbf16>
    tpu.vector_store %arg13[%c0_36, %c0_37], %35 {strides = array<i32>} : memref<8x4xbf16, #tpu.memory_space<vmem>>, vector<8x4xbf16>,
    %c0_38 = arith.constant 0 : index
    %c0_39 = arith.constant 0 : index
    %37 = vector.load %arg5[%c0_38, %c0_39] : memref<8x24xbf16, #tpu.memory_space<vmem>>, vector<8x24xbf16>
    %c0_40 = arith.constant 0 : index
    %c0_41 = arith.constant 0 : index
    %38 = vector.load %arg11[%c0_40, %c0_41] : memref<24x16xbf16, #tpu.memory_space<vmem>>, vector<24x16xbf16>
    %cst_42 = arith.constant dense<0.000000e+00> : vector<8x16xf32>
    %39 = tpu.matmul %37, %38, %cst_42 {dimension_numbers = #tpu.dot_dimension_numbers<[1], [0], [0], [1], [0, 0, 1, 1], [], []>} : vector<8x24xbf16>, vector<24x16xbf16>, vector<8x16xf32> -> vector<8x16xf32>
    %c0_43 = arith.constant 0 : index
    %c0_44 = arith.constant 0 : index
    %40 = vector.load %arg6[%c0_43, %c0_44] : memref<8x1xf32, #tpu.memory_space<vmem>>, vector<8x1xf32>
    %41 = vector.broadcast %40 : vector<8x1xf32> to vector<8x16xf32>
    %42 = arith.addf %39, %41 : vector<8x16xf32>
    %cst_45 = arith.constant 0.000000e+00 : f32
    %43 = vector.broadcast %cst_45 : f32 to vector<8x16xf32>
    %44 = arith.maximumf %42, %43 : vector<8x16xf32>
    %c0_46 = arith.constant 0 : index
    %c0_47 = arith.constant 0 : index
    %45 = vector.load %arg7[%c0_46, %c0_47] : memref<8x4xbf16, #tpu.memory_space<vmem>>, vector<8x4xbf16>
    %cst_48 = arith.constant dense<0.000000e+00> : vector<8x16xf32>
    %46 = tpu.matmul %45, %2, %cst_48 {dimension_numbers = #tpu.dot_dimension_numbers<[1], [0], [0], [1], [0, 0, 1, 1], [], []>} : vector<8x4xbf16>, vector<4x16xbf16>, vector<8x16xf32> -> vector<8x16xf32>
    %c0_49 = arith.constant 0 : index
    %c0_50 = arith.constant 0 : index
    %47 = vector.load %arg8[%c0_49, %c0_50] : memref<8x1xf32, #tpu.memory_space<vmem>>, vector<8x1xf32>
    %48 = vector.broadcast %47 : vector<8x1xf32> to vector<8x16xf32>
    %49 = arith.addf %46, %48 : vector<8x16xf32>
    %50 = arith.addf %44, %49 : vector<8x16xf32>
    %cst_51 = arith.constant 0.000000e+00 : f32
    %51 = vector.broadcast %cst_51 : f32 to vector<8x16xf32>
    %52 = arith.maximumf %50, %51 : vector<8x16xf32>
    %c0_52 = arith.constant 0 : index
    %c0_53 = arith.constant 0 : index
    %c0_54 = arith.constant 0 : index
    %53 = vector.load %arg9[%c0_52, %c0_53, %c0_54] : memref<1x8x16xf32, #tpu.memory_space<vmem>>, vector<1x8x16xf32>
    %54 = vector.shape_cast %53 : vector<1x8x16xf32> to vector<8x16xf32>
    %55 = vector.shape_cast %52 : vector<8x16xf32> to vector<1x8x16xf32>
    tpu.vector_store %arg9[%c0_52, %c0_53, %c0_54], %55 {strides = array<i32>} : memref<1x8x16xf32, #tpu.memory_space<vmem>>, vector<1x8x16xf32>,
    return
  }
  func.func @transform_0(%arg0: i32, %arg1: i32) -> (i32, i32, i32) {
    %c0_i32 = arith.constant 0 : i32
    %c0_i32_0 = arith.constant 0 : i32
    return %arg0, %c0_i32, %arg1 : i32, i32, i32
  }
  func.func @transform_1(%arg0: i32, %arg1: i32) -> (i32, i32) {
    %c0_i32 = arith.constant 0 : i32
    %c0_i32_0 = arith.constant 0 : i32
    %c0_i32_1 = arith.constant 0 : i32
    return %c0_i32, %c0_i32_0 : i32, i32
  }
  func.func @transform_2(%arg0: i32, %arg1: i32) -> (i32, i32) {
    %c0_i32 = arith.constant 0 : i32
    %c0_i32_0 = arith.constant 0 : i32
    %c0_i32_1 = arith.constant 0 : i32
    return %c0_i32, %c0_i32_0 : i32, i32
  }
  func.func @transform_3(%arg0: i32, %arg1: i32) -> (i32, i32) {
    %c0_i32 = arith.constant 0 : i32
    %c0_i32_0 = arith.constant 0 : i32
    %c0_i32_1 = arith.constant 0 : i32
    return %c0_i32, %c0_i32_0 : i32, i32
  }
  func.func @transform_4(%arg0: i32, %arg1: i32) -> (i32, i32) {
    %c0_i32 = arith.constant 0 : i32
    %c0_i32_0 = arith.constant 0 : i32
    %c0_i32_1 = arith.constant 0 : i32
    return %c0_i32, %c0_i32_0 : i32, i32
  }
  func.func @transform_5(%arg0: i32, %arg1: i32) -> (i32, i32) {
    %c0_i32 = arith.constant 0 : i32
    %c0_i32_0 = arith.constant 0 : i32
    %c0_i32_1 = arith.constant 0 : i32
    return %c0_i32, %c0_i32_0 : i32, i32
  }
  func.func @transform_6(%arg0: i32, %arg1: i32) -> (i32, i32) {
    %c0_i32 = arith.constant 0 : i32
    %c0_i32_0 = arith.constant 0 : i32
    %c0_i32_1 = arith.constant 0 : i32
    return %c0_i32, %c0_i32_0 : i32, i32
  }
  func.func @transform_7(%arg0: i32, %arg1: i32) -> (i32, i32, i32) {
    %c0_i32 = arith.constant 0 : i32
    %c0_i32_0 = arith.constant 0 : i32
    return %arg0, %c0_i32, %arg1 : i32, i32, i32
  }
}

</mosaic_0001>

<bundles_post_ra>
// kernel: tpu_custom_call.1
= control target key start
LH: loop header
LB: loop body
LE: loop exit
PB: predicated region body
PF: predicated region fallthrough
CT: control target
= control target key end

     0   :  { %12 = vsyncpa [#allocation7], 0  ;;  %s1068_s0 = inlined_call_operand.vmem [shape: f32[2,4,16], index: 0, kind: input, shape index: {}]   ;;  %s1069_s1 = inlined_call_operand.vmem [shape: bf16[8,12], index: 1, kind: input, shape index: {}]   ;;  %s1070_s2 = inlined_call_operand.vmem [shape: f32[8,1], index: 2, kind: input, shape index: {}]   ;;  %s1071_s3 = inlined_call_operand.vmem [shape: bf16[8,24], index: 3, kind: input, shape index: {}]   ;;  %s1072_s4 = inlined_call_operand.vmem [shape: f32[8,1], index: 4, kind: input, shape index: {}]   ;;  %s1073_s5 = inlined_call_operand.vmem [shape: bf16[8,4], index: 5, kind: input, shape index: {}]   ;;  %s1074_s6 = inlined_call_operand.vmem [shape: f32[8,1], index: 6, kind: input, shape index: {}]   ;;  %s1075_s7 = inlined_call_operand.hbm [shape: f32[2,8,16], index: 7, kind: output, shape index: {}]  }
   0x1   :  { %14 = vsyncpa [#allocation7 + $0x1], 0  ;;  %s907_s24 = smov 0   ;;  %s909_s25 = smov 0  }
   0x2   :  { %s911_s26 = smov 0   ;;  %s913_s27 = smov 0  }
   0x3   :  { %s915_s28 = smov 0   ;;  %s917_s29 = smov 0  }
   0x4 LB: > { %s661_s30 = sadd.s32 4294967295, %s856_s29   ;;  %s662_s8 = sadd.s32 4294967294, %s856_s29   ;;  %s856_s29 = sphi %s917_s29, %s20_s29   ;;  %s852_s28 = sphi %s915_s28, %s1082_s28   ;;  %s848_s27 = sphi %s913_s27, %s1081_s27   ;;  %s844_s26 = sphi %s911_s26, %s1080_s26   ;;  %s840_s25 = sphi %s909_s25, %s1079_s25   ;;  %s836_s24 = sphi %s907_s24, %s1078_s24  }
   0x5   : > { %s32_s9 = sadd.s32 1, %s852_s28  ;;  %s195_s10 = sadd.s32 1, %s844_s26 }
   0x6   : > { %p34_p0 = scmp.ge.s32.totalorder %s32_s9, 2  ;;  %p205_p1 = scmp.ne.s32.totalorder %s844_s26, %s840_s25 }
   0x7   : > { %p206_p2 = scmp.eq.s32.totalorder %s661_s30, 1  ;;  %p211_p3 = scmp.ne.s32.totalorder %s840_s25, %s836_s24 }
   0x8   : > { %s1084_s9 = smov (%p34_p0, %s32_s9), 0  ;;  %p212_p5 = scmp.eq.s32.totalorder %s662_s8, 1 }
   0x9   : > { %p947_p4 = por %p206_p2, %p205_p1  ;;  %s190_s12 = ssub.s32 %s852_s28, %s1084_s9 }
   0xa   : > { %p665_p6 = scmp.ge.s32.totalorder %s856_s29, 1  ;;  %p193_p7 = scmp.eq.s32.totalorder %s190_s12, 0 }
   0xb   : > { %p954_p8 = por %p212_p5, %p211_p3  ;;  %p258_p9 = scmp.lt.s32.totalorder %s856_s29, 3 }
   0xc   : > { %s960_s14 = scalar_select %p193_p7, %s844_s26, %s195_s10  }
   0xd   : > { %p259_p10 = pnand %p665_p6, %p258_p9 }
   0xe   : > { %vm306_vm0 = vcmask (!%p259_p10), 25600   ;;  %v327_v0 = vlaneseq (!%p259_p10)  ;;  %p292_p11 = scmp.lt.s32.totalorder (!%p259_p10), %s848_s27, 1  ;;  %v858_v1 = vmov (!%p259_p10), 0   ;;  %v859_v2 = vmov (!%p259_p10), 1983009808   ;;  %s861_s20 = smov (!%p259_p10), 2  }
   0xf   : > { %262 = sbr.rel (%p259_p10) target bundleno = 741 (0x2e5), region = 48  ;;  %307 = vst.msk [vmem:[#allocation4] sm:$0x3] (!%p259_p10), %vm306_vm0, %v858_v1  ;;  %v325_v3 = vunpack.c.l.s4 (!%p259_p10), %v859_v2  ;;  %772 = vset.pattern.permute.xlu1 (!%p259_p10), %v858_v1  ;;  %773 = vset.pattern.permute.xlu0 (!%p259_p10), %v858_v1  ;;  %v860_v6 = vmov (!%p259_p10), 0.0   ;;  %vm342_vm1 = vcmask (!%p259_p10), 123904   ;;  %s862_s21 = smov (!%p259_p10), 126  }
  0x10   : > { %v328_v4 = vshrl.u32 (!%p259_p10), %v327_v0, 7  ;;  %689 = vmatprep.subr.bf16.mxu0 (!%p259_p10), %v860_v6  ;;  %695 = vmatprep.subr.bf16.mxu1 (!%p259_p10), %v860_v6  ;;  %vm863_vm2 = vmmov (!%p259_p10), 0   ;;  %s864_s22 = smov (!%p259_p10), 4   ;;  %v358_v14 = vld [vmem:[%s1070_s2] sm:$0xff] (!%p259_p10)  ;;  %vm334_vm3 = vcmask (!%p259_p10), 11266   ;;  %vm340_vm4 = vcmask (!%p259_p10), 125970  }
  0x11   : > { %v326_v5 = vunpack.c.0.s8 (!%p259_p10), %v325_v3  ;;  %691 = vmatprep.mubr.msk.bf16.mxu0 (!%p259_p10), %vm863_vm2, %v860_v6  ;;  %699 = vmatprep.mubr.msk.bf16.mxu1 (!%p259_p10), %vm863_vm2, %v860_v6  ;;  %vm319_vm5 = vcmask (!%p259_p10), 123936   ;;  %vm373_vm6 = vcmask (!%p259_p10), 1045504   ;;  %v355_v20 = vld [vmem:[%s1069_s1] sm:$0xf] (!%p259_p10)  ;;  %vm369_vm7 = vcmask (!%p259_p10), 97280   ;;  %s865_s18 = smov (!%p259_p10), 116  }
  0x12   : > { %vm308_vm8 = vcmask (!%p259_p10), 27648   ;;  %vm435_vm9 = vcmask (!%p259_p10), 11264   ;;  %vm527_vm10 = vcmask (!%p259_p10), 1041408   ;;  %vm442_vm11 = vcmask (!%p259_p10), 125952   ;;  %v516_v33 = vld [vmem:[%s1073_s5] sm:$0xf] (!%p259_p10) }
  0x13   : > { %v970_v7 = vsub.s32 (!%p259_p10), %v326_v5, %v328_v4  ;;  %309 = vst.msk [vmem:[#allocation5] sm:$0xf] (!%p259_p10), %vm308_vm8, %v858_v1  ;;  %vm523_vm12 = vcmask (!%p259_p10), 31744   ;;  %v452_v34 = vld [vmem:[%s1072_s4] sm:$0xff] (!%p259_p10)  ;;  %vm440_vm13 = vcmask (!%p259_p10), 125968   ;;  %vm428_vm14 = vcmask (!%p259_p10), 125984  }
  0x14   : > { %v517_v36 = vld [vmem:[%s1074_s6] sm:$0xff] (!%p259_p10)  ;;  %vm471_vm15 = vcmask (!%p259_p10), 1043456   ;;  %s289_s23 = sand.u32 (!%p259_p10), 1, %s840_s25   ;;  %s677_s8 = sshll.u32 (!%p259_p10), %s848_s27, 7 }
  0x15   : > { %v448_v42 = vld [vmem:[%s1071_s3] sm:$0xf] (!%p259_p10)  ;;  %s666_s30 = sshll.u32 (!%p259_p10), %s289_s23, 3  ;;  %s1021_s17 = scalar_lea.hbm (!%p259_p10), %s1075_s7, %s677_s8 }
  0x16   : > { %s293_s15 = scalar_select %p292_p11, %s848_s27, 1  ;;  %v774_v10 = vld [vmem:[#allocation4] ss:$0 sps:$4 sm:$0x33]  }
  0x17   : > { %v310_v12 = vld [vmem:[#allocation4] sm:$0x3]  ;;  %v330_v13 = vrot.slane %v774_v10, %v970_v7  ;;  %s291_s10 = scalar_lea.vmem [#allocation6], %s666_s30  ;;  %s866_s27 = smov [#allocation6]  }
  0x18   : > { %s667_s16 = sshll.u32 %s293_s15, 2  ;;  %312 = vst.msk [vmem:[#allocation2] sm:$0x3] %vm306_vm0, %v310_v12  ;;  %s590_s12 = sshll.u32 %s291_s10, 4  ;;  %s1023_s12 = int_to_ptr.vmem [resolvable:$true] %s590_s12 }
  0x19   : > { %s298_s19 = scalar_lea.vmem %s1068_s0, %s667_s16  ;;  %331 = vrot.lane.b32.xlu0 %v330_v13, %s862_s21 }
  0x1a   : > { %v300_v8 = vld [vmem:[%s298_s19] sm:$0xf]  ;;  %v430_v21 = vld [vmem:[#allocation5] sm:$0xf]  ;;  %s778_s19 = scalar_lea.vmem %s1023_s12, 128 }
  0x1b   : > { %v972_v9 = vpack.c.bf16 %v300_v8, %v300_v8  ;;  %v419_v23 = vld [vmem:[#allocation5] sm:$0xf]  ;;  %p779_p12 = scmp.ne.s32.totalorder %s1023_s12, %s778_s19 }
  0x1c   : > { %421 = vst.msk [vmem:[#allocation3] sm:$0xf] %vm308_vm8, %v419_v23 }
  0x1d   : > { %343 = vst.msk [vmem:[#allocation2 + $0x4] sm:$0x3] %vm342_vm1, %v972_v9  ;;  %v336_v11 = vrot.slane %v972_v9, 6  ;;  %316 = vrot.lane.b32.xlu0 %v972_v9, %s864_s22  ;;  %v529_v31 = vsel %vm527_vm10, %v972_v9, 0  ;;  %v350_v35 = vrot.slane %v972_v9, %v970_v7  ;;  %vm467_vm1 = vcmask 195584   ;;  %p780_p13 = pnand %p779_p12, %p947_p4 }
  0x1f   : > { %337 = vrot.lane.b32.xlu1 %v336_v11, %s861_s20  ;;  %p781_p0 = pneg %p780_p13 }
  0x21   : > { %432 = vrot.lane.b32.xlu0 %v430_v21, %s862_s21 }
  0x23   : > { %361 = vperm.xlu1 %772, %v358_v14  }
  0x8b   : > { %v332_v16 = vpop.permute.xlu0 %331 }
  0x8c   : > { %335 = vst.msk [vmem:[#allocation2] sm:$0xc] %vm334_vm3, %v332_v16 }
  0x8f   : > { %v317_v17 = vpop.permute.xlu0 %316 }
  0x90   : > { %320 = vst.msk [vmem:[#allocation2] sm:$0x3] %vm319_vm5, %v317_v17 }
  0x91   : > { %v338_v15 = vpop.permute.xlu1 %337 }
  0x92   : > { %341 = vst.msk [vmem:[#allocation2] sm:$0xc] %vm340_vm4, %v338_v15 }
  0x93   : > { %v433_v22 = vpop.permute.xlu0 %432 }
  0x94   : > { %436 = vst.msk [vmem:[#allocation3 + $0x4] sm:$0xf] %vm435_vm9, %v433_v22 }
  0x99   : > { %v775_v18 = vld [vmem:[#allocation2] sm:$0x3f]  }
  0x9a   : > { %v375_v19 = vsel %vm373_vm6, %v775_v18, 0 }
  0x9b   : > { %690 = vmatpush3.bf16.msra.mxu0 %v375_v19 }
  0x9c   : > { %703 = vmatprep.subr.bf16.mxu0 %v860_v6 }
  0x9e   : > { %692 = vmatmul.mubr.msk.bf16.vlgmr.msra.gmra.mrb[0].mxu0 %vm369_vm7, %v355_v20 }
  0x9f   : > { %705 = vmatprep.mubr.msk.bf16.mxu0 %vm863_vm2, %v860_v6  ;;  %704 = vmatpush3.bf16.msra.mxu0 %v529_v31 }
  0xa2   : > { %v362_v24 = vpop.permute.xlu1 %361 }
  0xa6   : > { %706 = vmatmul.mubr.msk.bf16.vlgmr.msra.gmra.mrb[4].mxu0 %vm523_vm12, %v516_v33 }
 0x171   : > { %v411_v25 = vpop.f32.mrb[0].mxu0 }
 0x172   : > { %v412_v26 = vadd.f32 %v411_v25, %v362_v24  ;;  %v693_v27 = vpop.f32.mrb[1].mxu0 }
 0x173   : > { %v414_v28 = vpop.f32.mrb[2].mxu0 }
 0x174   : > { %v417_v29 = vmax.f32 %v412_v26, 0.0  ;;  %v694_v30 = vpop.f32.mrb[3].mxu0 }
 0x176   : > { %v418_v32 = vpack.c.bf16 %v417_v29, %v417_v29 }
 0x178   : > { %443 = vst.msk [vmem:[#allocation3 + $0x8] sm:$0xf] %vm442_vm11, %v418_v32  ;;  %437 = vrot.lane.b32.xlu0 %v418_v32, %s861_s20  ;;  %425 = vrot.lane.b32.xlu1 %v418_v32, %s864_s22  ;;  %s782_s20 = sshll.u32 %s866_s27, 4  ;;  %s783_s20 = int_to_ptr.vmem [resolvable:$false] %s782_s20 }
 0x179   : > { %v565_v46 = vpop.f32.mrb[4].mxu0  ;;  %s784_s21 = scalar_lea.vmem %s783_s20, 256  ;;  %p785_p1 = scmp.lt.s32.totalorder %s1023_s12, %s783_s20 }
 0x17a   : > { %v707_v47 = vpop.f32.mrb[5].mxu0  ;;  %p786_p2 = scmp.lt.s32.totalorder %s784_s21, %s778_s19 }
 0x17b   : > { %v568_v48 = vpop.f32.mrb[6].mxu0 }
 0x17c   : > { %455 = vperm.xlu1 %772, %v452_v34   ;;  %520 = vperm.xlu0 %773, %v517_v36   ;;  %v708_v49 = vpop.f32.mrb[7].mxu0  ;;  %p787_p3 = por %p786_p2, %p785_p1 }
 0x17e   : > { %p788_p5 = pnand %p787_p3, %p781_p0 }
 0x17f   : > { %v777_v40 = vld [vmem:[#allocation3 + $0x8] ss:$0 sps:$4 sm:$0xff]  }
 0x180   : > { %351 = vrot.lane.b32.xlu1 %v350_v35, %s865_s18  ;;  %v473_v41 = vsel %vm471_vm15, %v777_v40, 0 }
 0x184   : > { %444 = vrot.lane.b32.xlu1 %v418_v32, %s865_s18  ;;  %s576_s18 = scalar_lea.sflag [#allocation7], %s289_s23 }
 0x1ea   : > { %v438_v37 = vpop.permute.xlu0 %437  ;;  %v426_v38 = vpop.permute.xlu1 %425 }
 0x1eb   : > { %441 = vst.msk [vmem:[#allocation3 + $0x4] sm:$0xf] %vm440_vm13, %v438_v37 }
 0x1ec   : > { %429 = vst.msk [vmem:[#allocation3] sm:$0xf] %vm428_vm14, %v426_v38 }
 0x1f3   : > { %v776_v39 = vld [vmem:[#allocation3] sm:$0xff]  }
 0x1f4   : > { %696 = vmatpush3.bf16.msra.mxu1 %v776_v39 }
 0x1f5   : > { %697 = vmatprep.subr.bf16.mxu1 %v860_v6 }
 0x1f8   : > { %698 = vmatpush3.bf16.msra.mxu1 %v473_v41 }
 0x1fb   : > { %v456_v43 = vpop.permute.xlu1 %455  ;;  %700 = vmatmul.mubr.msk.bf16.vlgmr.msra.gmra.mrb[0].mxu1 %vm467_vm1, %v448_v42  ;;  %v521_v50 = vpop.permute.xlu0 %520 }
 0x1fc   : > { %v566_v54 = vadd.f32 %v565_v46, %v521_v50 }
 0x1ff   : > { %v352_v44 = vpop.permute.xlu1 %351 }
 0x200   : > { %354 = vst.msk [vmem:[#allocation4] sm:$0x3] %vm306_vm0, %v352_v44  ;;  %vm573_vm0 = vcmask 130048  }
 0x203   : > { %v445_v45 = vpop.permute.xlu1 %444 }
 0x204   : > { %447 = vst.msk [vmem:[#allocation5] sm:$0xf] %vm308_vm8, %v445_v45 }
 0x2ce   : > { %v509_v51 = vpop.f32.mrb[0].mxu1 }
 0x2cf   : > { %v510_v52 = vadd.f32 %v509_v51, %v456_v43  ;;  %v701_v53 = vpop.f32.mrb[1].mxu1 }
 0x2d0   : > { %v512_v55 = vpop.f32.mrb[2].mxu1 }
 0x2d1   : > { %v515_v56 = vmax.f32 %v510_v52, 0.0  ;;  %v702_v57 = vpop.f32.mrb[3].mxu1 }
 0x2d3   : > { %v571_v58 = vadd.f32 %v566_v54, %v515_v56 }
 0x2d5   : > { %v572_v59 = vmax.f32 %v571_v58, 0.0 }
 0x2d7   : > { %574 = vst.msk [vmem:[%s291_s10] sm:$0xff] %vm573_vm0, %v572_v59 }
 0x2d8   : > { %791 = shalt.err (!%p788_p5)
}
 0x2d9   : > { %s792_s22 = scalar_lea.hbm %s1021_s17, 128  ;;  %s796_s8 = scalar_lea.hbm %s1075_s7, 256 }
 0x2da   : > { %p793_p6 = scmp.ne.s32.totalorder %s1021_s17, %s792_s22  ;;  %p797_p10 = scmp.lt.u32.totalorder %s1021_s17, %s1075_s7 }
 0x2db   : > { %p798_p11 = scmp.lt.u32.totalorder %s796_s8, %s792_s22  ;;  %p800_p13 = scmp.lt.u32.totalorder %s792_s22, %s1021_s17 }
 0x2dc   : > { %p794_p7 = pnand %p793_p6, %p947_p4 }
 0x2dd   : > { %p799_p12 = por %p798_p11, %p797_p10 }
 0x2de   : > { %p795_p9 = pneg %p794_p7 }
 0x2df   : > { %p801_p0 = por %p800_p13, %p799_p12 }
 0x2e1   : > { %p802_p1 = pnand %p801_p0, %p795_p9 }
 0x2e3   : > { %805 = shalt.err (!%p802_p1)
}
 0x2e4   : > { %709 = dma.vmem_to_hbm [thread:$0]  (%p947_p4), %s1023_s12, 128, %s1021_s17, %s576_s18  }
 0x2e5 PF: > { %p715_p2 = scmp.ge.s32.totalorder %s856_s29, 2  ;;  %s602_s16 = sand.u32 1, %s836_s24  }
 0x2e6   : > { %s603_s19 = scalar_lea.sflag [#allocation7], %s602_s16 }
 0x2e7   : > { %p712_p3 = pnand %p715_p2, %p954_p8 }
 0x2e9   : > { %831 = dma.done.wait (!%p712_p3), %s603_s19, 128  }
 0x2ea   : > { %833 = vsyncadd (!%p712_p3), %s603_s19, 4294967168  ;;  %s20_s29 = sadd.s32 1, %s856_s29   ;;  %s1078_s24 = smov %s840_s25 }
 0x2eb   : > { %p17_p5 = scmp.ge.s32.totalorder %s20_s29, 4   ;;  %s1079_s25 = smov %s844_s26 }
 0x2ec   : > { %s1080_s26 = smov %s960_s14  ;;  %s1081_s27 = smov %s852_s28 }
 0x2ed   : > { %s1082_s28 = smov %s1084_s9  ;;  %19 = sbr.rel (!%p17_p5) target bundleno = 4 (0x4), region = 87 }
 0x2f4   :  { %608 = vsyncpa [#allocation7], 1 }
 0x2f5   :  { %610 = vsyncpa [#allocation7 + $0x1], 1 }

</bundles_post_ra>
